<compile_context>
chip_gen: v7x
topology: tpu7x:2x2x1
jax: 0.10.0
libtpu: 0.0.40
codegen_flags: <defaults>
</compile_context>

<pallas_src>
import functools

import jax
import jax.numpy as jnp
from jax.experimental import pallas as pl
from jax.experimental.pallas import tpu as pltpu


_TRANSCENDENTAL_ACTS = ("tanh", "sigmoid", "elu", "selu", "softplus", "swish")


def _apply_activation(y, activation):
    if activation == "linear":
        return y
    if activation == "relu":
        return jnp.maximum(y, 0.0)
    if activation == "lrelu":
        return jnp.where(y >= 0.0, y, 0.2 * y)
    if activation == "tanh":
        return jnp.tanh(y)
    if activation == "sigmoid":
        return jax.nn.sigmoid(y)
    if activation == "elu":
        return jnp.where(y >= 0.0, y, jnp.expm1(y))
    if activation == "selu":
        alpha = 1.6732632423543772
        scale = 1.0507009873554805
        return scale * jnp.where(y >= 0.0, y, alpha * jnp.expm1(y))
    if activation == "softplus":
        return jax.nn.softplus(y)
    if activation == "swish":
        return jax.nn.sigmoid(y) * y
    raise ValueError(f"unknown activation: {activation}")


def _round_up(x, m):
    return ((x + m - 1) // m) * m


def _choose_tile(size, align, max_tile):
    """Largest tile <= max_tile (multiple of `align`) minimizing padding waste."""
    aligned = _round_up(size, align)
    if aligned <= max_tile:
        return aligned                      # single block along this axis
    best_t, best_pad = align, None
    for t in range(align, max_tile + 1, align):
        pad = _round_up(size, t) - size
        if best_pad is None or pad < best_pad or (pad == best_pad and t > best_t):
            best_t, best_pad = t, pad
    return best_t


def _device_kind():
    try:
        return jax.devices()[0].device_kind.lower()
    except Exception:
        return ""


def _vmem_capacity_bytes():
    try:
        return int(pltpu.get_tpu_info().vmem_capacity_bytes)
    except Exception:
        return (64 if "v7" in _device_kind() else 128) * 1024 * 1024


def _dot_t(x_tile, w_tile):
    # (tm, tk) . (tn, tk) contracting dim 1 of both == x @ w.T : fed straight
    # to the MXU (transposed-RHS push), f32 accumulation.
    return jax.lax.dot_general(
        x_tile, w_tile,
        dimension_numbers=(((1,), (1,)), ((), ())),
        preferred_element_type=jnp.float32)


def _epilogue(acc_f32, b_ref, o_ref, weight_gain, bias_gain, activation):
    y = acc_f32 * jnp.float32(weight_gain)
    if b_ref is not None:
        y = y + b_ref[...].astype(jnp.float32) * jnp.float32(bias_gain)
    y = _apply_activation(y, activation)
    o_ref[...] = y.astype(o_ref.dtype)


def _fc_kernel_single(*refs, weight_gain, bias_gain, activation, has_bias):
    """Fast path: K fits in a single tile -> no accumulator round trip."""
    if has_bias:
        x_ref, w_ref, b_ref, o_ref = refs
    else:
        x_ref, w_ref, o_ref = refs
        b_ref = None
    _epilogue(_dot_t(x_ref[...], w_ref[...]), b_ref, o_ref,
              weight_gain, bias_gain, activation)


def _fc_kernel_multi(*refs, weight_gain, bias_gain, activation, has_bias):
    """General path: K-axis reduction with a resident f32 accumulator."""
    if has_bias:
        x_ref, w_ref, b_ref, o_ref, acc_ref = refs
    else:
        x_ref, w_ref, o_ref, acc_ref = refs
        b_ref = None

    k = pl.program_id(2)
    partial = _dot_t(x_ref[...], w_ref[...])

    @pl.when(k == 0)
    def _():                              # direct assign: no zero-fill pass
        acc_ref[...] = partial

    @pl.when(k > 0)
    def _():
        acc_ref[...] += partial

    @pl.when(k == pl.num_programs(2) - 1)
    def _():
        _epilogue(acc_ref[...], b_ref, o_ref, weight_gain, bias_gain, activation)


def fully_connected_layer(x, weight, bias=None, *, activation="linear",
                          lr_multiplier=1.0, compute_dtype=None,
                          max_tm=512, max_tn=512, max_tk=2048):
    """Pallas TPU implementation of FullyConnectedLayer.forward.

    x:      (N, in_features)
    weight: (out_features, in_features)   (PyTorch layout)
    bias:   (out_features,) or None
    compute_dtype: optional dtype (e.g. jnp.bfloat16) to cast x / weight to
        before the MXU; accumulation and epilogue stay f32, output keeps x.dtype.
    """
    n, in_features = x.shape
    out_features, in_features_w = weight.shape
    assert in_features_w == in_features

    weight_gain = float(lr_multiplier) / (float(in_features) ** 0.5)
    bias_gain = float(lr_multiplier)
    has_bias = bias is not None
    out_dtype = x.dtype

    cdtype = jnp.dtype(compute_dtype) if compute_dtype is not None else jnp.dtype(x.dtype)
    in_isz = cdtype.itemsize
    out_isz = jnp.dtype(out_dtype).itemsize
    sub_mult = {4: 8, 2: 16, 1: 32}.get(in_isz, 8)   # sublane packing multiple

    kind = _device_kind()
    xw_bufs = 3 if "v5" in kind else 2               # deeper pipeline on slow-HBM v5e

    # ---- tile selection (minimize padding waste) -------------------------
    tk = _choose_tile(in_features, 128, max_tk)
    tn = _choose_tile(out_features, 128, max_tn)
    tm = _choose_tile(n, sub_mult, max_tm)

    # ---- generation-aware VMEM budget ------------------------------------
    cap = _vmem_capacity_bytes()
    if cap <= 64 * 1024 * 1024:            # v7x: 64 MiB per TensorCore
        budget = 52 * 1024 * 1024
    else:                                  # v5e / v6e: 128 MiB physical
        budget = min(int(0.8 * cap), 100 * 1024 * 1024)

    bias_isz = jnp.dtype(bias.dtype).itemsize if has_bias else 0

    def _footprint(tm_, tn_, tk_):
        multi_k_ = _round_up(in_features, tk_) // tk_ > 1
        fp = xw_bufs * (tm_ * tk_ + tn_ * tk_) * in_isz     # pipelined x / w
        fp += 2 * tm_ * tn_ * out_isz                       # pipelined output
        if has_bias:
            fp += 2 * tn_ * bias_isz
        if multi_k_:
            fp += tm_ * tn_ * 4                             # f32 accumulator
        return fp

    while _footprint(tm, tn, tk) > int(0.85 * budget):
        if tk >= max(tn, tm) and tk > 128:
            tk = _round_up(tk // 2, 128)
        elif tn >= tm and tn > 128:
            tn = _round_up(tn // 2, 128)
        elif tm > sub_mult:
            tm = _round_up(tm // 2, sub_mult)
        else:
            break

    # ---- v7x megacore: make sure both TensorCores get parallel work ------
    if "v7" in kind:
        if (_round_up(n, tm) // tm) * (_round_up(out_features, tn) // tn) == 1:
            if tn >= 256:
                tn //= 2
            elif tm >= 2 * sub_mult:
                tm = _round_up(tm // 2, sub_mult)

    m_pad = _round_up(n, tm)
    n_pad = _round_up(out_features, tn)
    k_pad = _round_up(in_features, tk)
    grid_m, grid_n, grid_k = m_pad // tm, n_pad // tn, k_pad // tk

    # ---- wrapper-side prep: optional bf16 cast, pad only when needed -----
    x_p = x.astype(cdtype) if cdtype != x.dtype else x
    w_p = weight.astype(cdtype) if cdtype != weight.dtype else weight

    def _pad2d(a, rows, cols):
        pr, pc = rows - a.shape[0], cols - a.shape[1]
        if pr or pc:
            a = jnp.pad(a, ((0, pr), (0, pc)))
        return a

    x_p = _pad2d(x_p, m_pad, k_pad)
    w_p = _pad2d(w_p, n_pad, k_pad)

    def _xw_spec(shape, index_map):
        if xw_bufs > 2:
            try:
                return pl.BlockSpec(shape, index_map,
                                    pipeline_mode=pl.Buffered(xw_bufs))
            except TypeError:
                return pl.BlockSpec(shape, index_map)
        return pl.BlockSpec(shape, index_map)

    operands = [x_p, w_p]
    single_k = grid_k == 1

    if single_k:
        grid = (grid_m, grid_n)
        in_specs = [_xw_spec((tm, tk), lambda i, j: (i, 0)),
                    _xw_spec((tn, tk), lambda i, j: (j, 0))]
        out_spec = pl.BlockSpec((tm, tn), lambda i, j: (i, j))
        bias_spec = pl.BlockSpec((1, tn), lambda i, j: (0, j))
        scratch_shapes = []
        dim_sem = ("parallel", "parallel")
        kernel_fn = _fc_kernel_single
    else:
        grid = (grid_m, grid_n, grid_k)
        in_specs = [_xw_spec((tm, tk), lambda i, j, k: (i, k)),
                    _xw_spec((tn, tk), lambda i, j, k: (j, k))]
        out_spec = pl.BlockSpec((tm, tn), lambda i, j, k: (i, j))
        bias_spec = pl.BlockSpec((1, tn), lambda i, j, k: (0, j))
        scratch_shapes = [pltpu.VMEM((tm, tn), jnp.float32)]
        dim_sem = ("parallel", "parallel", "arbitrary")
        kernel_fn = _fc_kernel_multi

    if has_bias:
        b_p = bias.reshape(1, out_features)
        if n_pad != out_features:
            b_p = jnp.pad(b_p, ((0, 0), (0, n_pad - out_features)))
        in_specs.append(bias_spec)
        operands.append(b_p)

    kernel = functools.partial(kernel_fn, weight_gain=weight_gain,
                               bias_gain=bias_gain, activation=activation,
                               has_bias=has_bias)

    # ---- honest cost estimate (includes grid revisit factors) ------------
    flops = 2 * m_pad * n_pad * k_pad
    transcendentals = m_pad * n_pad if activation in _TRANSCENDENTAL_ACTS else 0
    bytes_accessed = (m_pad * k_pad * in_isz * grid_n      # x re-read per N block
                      + n_pad * k_pad * in_isz * grid_m    # w re-read per M block
                      + m_pad * n_pad * out_isz)
    if has_bias:
        bytes_accessed += n_pad * bias_isz * grid_m

    out_p = pl.pallas_call(
        kernel,
        out_shape=jax.ShapeDtypeStruct((m_pad, n_pad), out_dtype),
        grid_spec=pltpu.PrefetchScalarGridSpec(
            num_scalar_prefetch=0,
            grid=grid,
            in_specs=in_specs,
            out_specs=out_spec,
            scratch_shapes=scratch_shapes,
        ),
        compiler_params=pltpu.CompilerParams(
            dimension_semantics=dim_sem,
            vmem_limit_bytes=int(budget),
        ),
        cost_estimate=pl.CostEstimate(
            flops=int(flops),
            transcendentals=int(transcendentals),
            bytes_accessed=int(bytes_accessed),
        ),
    )(*operands)

    if m_pad != n or n_pad != out_features:
        out_p = out_p[:n, :out_features]
    return out_p


def _reference(x, weight, bias, *, activation="linear", lr_multiplier=1.0):
    in_features = x.shape[1]
    w = weight.astype(x.dtype) * (lr_multiplier / (in_features ** 0.5))
    y = x @ w.T
    if bias is not None:
        y = y + (bias.astype(x.dtype) * lr_multiplier)[None, :]
    return _apply_activation(y.astype(jnp.float32), activation).astype(x.dtype)


if __name__ == "__main__":
    key = jax.random.PRNGKey(0)
    k_x, k_w, k_x3, k_w3, k_b3 = jax.random.split(key, 5)

    # --- Test 1: StyleGAN mapping-style FC (lr_multiplier=0.01, lrelu, bias)
    batch, in_f, out_f = 8, 32, 32
    lr_mult = 0.01
    x = jax.random.normal(k_x, (batch, in_f), dtype=jnp.float32)
    weight = jax.random.normal(k_w, (out_f, in_f), dtype=jnp.float32) / lr_mult
    bias = jnp.zeros((out_f,), dtype=jnp.float32)

    out = jax.block_until_ready(fully_connected_layer(
        x, weight, bias, activation="lrelu", lr_multiplier=lr_mult))
    ref = _reference(x, weight, bias, activation="lrelu", lr_multiplier=lr_mult)
    assert out.shape == (batch, out_f)
    assert jnp.allclose(out, ref, atol=1e-5, rtol=1e-5), "mismatch (lrelu+bias)"

    # --- Test 2: no bias, linear activation (fast single-K path, no bias op)
    out2 = jax.block_until_ready(fully_connected_layer(
        x, weight, None, activation="linear", lr_multiplier=1.0))
    ref2 = _reference(x, weight, None, activation="linear", lr_multiplier=1.0)
    assert jnp.allclose(out2, ref2, atol=1e-4, rtol=1e-4), "mismatch (no bias)"

    # --- Test 3: multi-K accumulator path (forced small tk), tanh + bias
    b3, i3, o3 = 16, 256, 128
    x3 = jax.random.normal(k_x3, (b3, i3), dtype=jnp.float32)
    w3 = jax.random.normal(k_w3, (o3, i3), dtype=jnp.float32)
    bias3 = jax.random.normal(k_b3, (o3,), dtype=jnp.float32)
    out3 = jax.block_until_ready(fully_connected_layer(
        x3, w3, bias3, activation="tanh", lr_multiplier=1.0, max_tk=128))
    ref3 = _reference(x3, w3, bias3, activation="tanh", lr_multiplier=1.0)
    assert jnp.allclose(out3, ref3, atol=1e-4, rtol=1e-4), "mismatch (multi-K)"

    # --- Test 4: optional bf16 MXU compute path (relaxed tolerance)
    out4 = jax.block_until_ready(fully_connected_layer(
        x, weight, bias, activation="lrelu", lr_multiplier=lr_mult,
        compute_dtype=jnp.bfloat16))
    assert jnp.allclose(out4.astype(jnp.float32), ref, atol=5e-2, rtol=5e-2), \
        "mismatch (bf16 compute)"

    print("KERNEL_OK")
</pallas_src>

<mosaic_0001>
module attributes {stable_mosaic.version = 11 : i64} {
  func.func @_fc_kernel_single(%arg0: i32, %arg1: i32, %arg2: memref<8x128xf32, #tpu.memory_space<vmem>>, %arg3: memref<128x128xf32, #tpu.memory_space<vmem>>, %arg4: memref<1x128xf32, #tpu.memory_space<vmem>>, %arg5: memref<8x128xf32, #tpu.memory_space<vmem>>) attributes {dimension_semantics = [#tpu.dimension_semantics<parallel>, #tpu.dimension_semantics<parallel>], iteration_bounds = array<i64: 1, 1>, scalar_prefetch = 0 : i64, scratch_operands = 0 : i64, tpu.core_type = #tpu.core_type<tc>, window_params = [{transform_indices = @transform_0, window_bounds = array<i64: 8, 128>}, {transform_indices = @transform_1, window_bounds = array<i64: 128, 128>}, {transform_indices = @transform_2, window_bounds = array<i64: 1, 128>}, {transform_indices = @transform_3, window_bounds = array<i64: 8, 128>}]} {
    %c0 = arith.constant 0 : index
    %c0_0 = arith.constant 0 : index
    %0 = vector.load %arg2[%c0, %c0_0] : memref<8x128xf32, #tpu.memory_space<vmem>>, vector<8x128xf32>
    %c0_1 = arith.constant 0 : index
    %c0_2 = arith.constant 0 : index
    %1 = vector.load %arg3[%c0_1, %c0_2] : memref<128x128xf32, #tpu.memory_space<vmem>>, vector<128x128xf32>
    %cst = arith.constant dense<0.000000e+00> : vector<8x128xf32>
    %2 = tpu.matmul %0, %1, %cst {dimension_numbers = #tpu.dot_dimension_numbers<[1], [1], [0], [0], [0, 0, 1, 0], [], []>} : vector<8x128xf32>, vector<128x128xf32>, vector<8x128xf32> -> vector<8x128xf32>
    %cst_3 = arith.constant 0.00176776689 : f32
    %3 = vector.broadcast %cst_3 : f32 to vector<8x128xf32>
    %4 = arith.mulf %2, %3 : vector<8x128xf32>
    %c0_4 = arith.constant 0 : index
    %c0_5 = arith.constant 0 : index
    %5 = vector.load %arg4[%c0_4, %c0_5] : memref<1x128xf32, #tpu.memory_space<vmem>>, vector<1x128xf32>
    %cst_6 = arith.constant 0.00999999977 : f32
    %6 = vector.broadcast %cst_6 : f32 to vector<1x128xf32>
    %7 = arith.mulf %5, %6 : vector<1x128xf32>
    %8 = vector.broadcast %7 : vector<1x128xf32> to vector<8x128xf32>
    %9 = arith.addf %4, %8 : vector<8x128xf32>
    %cst_7 = arith.constant 0.000000e+00 : f32
    %10 = vector.broadcast %cst_7 : f32 to vector<8x128xf32>
    %11 = arith.cmpf oge, %9, %10 : vector<8x128xf32>
    %cst_8 = arith.constant 2.000000e-01 : f32
    %12 = vector.broadcast %cst_8 : f32 to vector<8x128xf32>
    %13 = arith.mulf %12, %9 : vector<8x128xf32>
    %14 = arith.select %11, %9, %13 : vector<8x128xi1>, vector<8x128xf32>
    %c0_9 = arith.constant 0 : index
    %c0_10 = arith.constant 0 : index
    %15 = vector.load %arg5[%c0_9, %c0_10] : memref<8x128xf32, #tpu.memory_space<vmem>>, vector<8x128xf32>
    tpu.vector_store %arg5[%c0_9, %c0_10], %14 {strides = array<i32>} : memref<8x128xf32, #tpu.memory_space<vmem>>, vector<8x128xf32>,
    return
  }
  func.func @transform_0(%arg0: i32, %arg1: i32) -> (i32, i32) {
    %c0_i32 = arith.constant 0 : i32
    %c0_i32_0 = arith.constant 0 : i32
    return %arg0, %c0_i32 : i32, i32
  }
  func.func @transform_1(%arg0: i32, %arg1: i32) -> (i32, i32) {
    %c0_i32 = arith.constant 0 : i32
    %c0_i32_0 = arith.constant 0 : i32
    return %arg1, %c0_i32 : i32, i32
  }
  func.func @transform_2(%arg0: i32, %arg1: i32) -> (i32, i32) {
    %c0_i32 = arith.constant 0 : i32
    %c0_i32_0 = arith.constant 0 : i32
    return %c0_i32, %arg1 : i32, i32
  }
  func.func @transform_3(%arg0: i32, %arg1: i32) -> (i32, i32) {
    %c0_i32 = arith.constant 0 : i32
    return %arg0, %arg1 : i32, i32
  }
}

</mosaic_0001>

<bundles_post_ra>
// kernel: tpu_custom_call.1
= control target key start
LH: loop header
LB: loop body
LE: loop exit
PB: predicated region body
PF: predicated region fallthrough
CT: control target
= control target key end

     0   :  { %8 = vsyncpa [#allocation3], 0  ;;  %s425_s0 = inlined_call_operand.hbm [shape: f32[8,128], index: 0, kind: input, shape index: {}]   ;;  %s426_s1 = inlined_call_operand.hbm [shape: f32[128,128], index: 1, kind: input, shape index: {}]   ;;  %s427_s2 = inlined_call_operand.hbm [shape: f32[1,128], index: 2, kind: input, shape index: {}]   ;;  %s428_s3 = inlined_call_operand.hbm [shape: f32[8,128], index: 3, kind: output, shape index: {}]  }
   0x1   :  { %9 = vsyncpa [#allocation6], 0 }
   0x2   :  { %10 = vsyncpa [#allocation4], 0  ;;  %s348_s12 = smov [#allocation5]   ;;  %s254_s16 = scalar_lea.hbm %s426_s1, 2048 }
   0x3   :  { %s26_s13 = sshll.u32 %s348_s12, 4  ;;  %p255_p0 = scmp.ne.s32.totalorder %s426_s1, %s254_s16  ;;  %s27_s13 = int_to_ptr.vmem [resolvable:$true] %s26_s13 }
   0x4   :  { %p258_p1 = scmp.lt.u32.totalorder %s254_s16, %s426_s1 }
   0x6   :  { %p260_p2 = pnand %p258_p1, %p255_p0 }
   0x8   :  { %263 = shalt.err (!%p260_p2)
}
   0x9   :  { %s264_s21 = scalar_lea.vmem %s27_s13, 2048  ;;  %p269_p4 = scmp.lt.s32.totalorder %s27_s13, %s27_s13 }
   0xa   :  { %p265_p3 = scmp.ne.s32.totalorder %s27_s13, %s264_s21  ;;  %p270_p5 = scmp.lt.s32.totalorder %s264_s21, %s264_s21 }
   0xc   :  { %p271_p6 = por %p270_p5, %p269_p4 }
   0xe   :  { %p272_p7 = pnand %p271_p6, %p265_p3 }
  0x10   :  { %275 = shalt.err (!%p272_p7)
}
  0x11   :  { %s349_s22 = smov 128   ;;  %s350_s23 = smov 8  }
  0x12   :  { %32 = dma.hbm_to_vmem [thread:$0]  %s426_s1, 2048, %s27_s13, [#allocation6], %s349_s22, %s349_s22, %s350_s23  }
  0x13   :  { %s351_s26 = smov [#allocation2]   ;;  %s352_s28 = smov [#allocation7]  }
  0x14   :  { %s17_s27 = sshll.u32 %s351_s26, 4  ;;  %s39_s29 = sshll.u32 %s352_s28, 4  ;;  %s18_s27 = int_to_ptr.vmem [resolvable:$true] %s17_s27  ;;  %s40_s29 = int_to_ptr.vmem [resolvable:$true] %s39_s29 }
  0x15   :  { %s276_s5 = scalar_lea.hbm %s425_s0, 128 }
  0x16   :  { %p277_p8 = scmp.ne.s32.totalorder %s425_s0, %s276_s5  ;;  %p280_p9 = scmp.lt.u32.totalorder %s276_s5, %s425_s0 }
  0x18   :  { %p282_p10 = pnand %p280_p9, %p277_p8 }
  0x1a   :  { %285 = shalt.err (!%p282_p10)
}
  0x1b   :  { %s286_s1 = scalar_lea.vmem %s18_s27, 128  ;;  %p291_p12 = scmp.lt.s32.totalorder %s18_s27, %s18_s27 }
  0x1c   :  { %p287_p11 = scmp.ne.s32.totalorder %s18_s27, %s286_s1  ;;  %p292_p13 = scmp.lt.s32.totalorder %s286_s1, %s286_s1 }
  0x1e   :  { %p293_p0 = por %p292_p13, %p291_p12 }
  0x20   :  { %p294_p1 = pnand %p293_p0, %p287_p11 }
  0x22   :  { %297 = shalt.err (!%p294_p1)
}
  0x23   :  { %20 = dma.hbm_to_vmem [thread:$0]  %s425_s0, 128, %s18_s27, [#allocation3]  }
  0x24   :  { %s298_s14 = scalar_lea.hbm %s427_s2, 16 }
  0x25   :  { %p299_p2 = scmp.ne.s32.totalorder %s427_s2, %s298_s14  ;;  %p302_p3 = scmp.lt.u32.totalorder %s298_s14, %s427_s2 }
  0x27   :  { %p304_p4 = pnand %p302_p3, %p299_p2 }
  0x29   :  { %307 = shalt.err (!%p304_p4)
}
  0x2a   :  { %s308_s19 = scalar_lea.vmem %s40_s29, 16  ;;  %s312_s20 = scalar_lea.vmem %s40_s29, 32 }
  0x2b   :  { %p309_p5 = scmp.ne.s32.totalorder %s40_s29, %s308_s19  ;;  %p313_p6 = scmp.lt.s32.totalorder %s40_s29, %s40_s29 }
  0x2c   :  { %p314_p7 = scmp.lt.s32.totalorder %s312_s20, %s308_s19 }
  0x2e   :  { %p315_p8 = por %p314_p7, %p313_p6 }
  0x30   :  { %p316_p9 = pnand %p315_p8, %p309_p5 }
  0x32   :  { %319 = shalt.err (!%p316_p9)
}
  0x33   :  { %42 = dma.hbm_to_vmem [thread:$0]  %s427_s2, 16, %s40_s29, [#allocation6]  }
  0x34   :  { %342 = dma.done.wait [#allocation3], 128  }
  0x35   :  { %343 = vsyncadd [#allocation3], 4294967168 }
  0x36   :  { %344 = dma.done.wait [#allocation6], 2064  }
  0x37   :  { %345 = vsyncadd [#allocation6], 4294965232  ;;  %v353_v0 = vmov 0.0|0.0   ;;  %vm354_vm0 = vmmov 0   ;;  %v355_v1 = vmov 0.0   ;;  %v53_v2 = vld [vmem:[#allocation5] sm:$0xff]  ;;  %v143_v27 = vlaneseq }
  0x38   :  { %221 = vmatprep.subr.bf16.mxu0 %v353_v0  ;;  %218 = vmatprep.mubr.msk.f32.mxu0 %vm354_vm0, %v355_v1  ;;  %v54_v3 = vld [vmem:[#allocation5 + $0x8] sm:$0xff]  ;;  %v55_v5 = vld [vmem:[#allocation5 + $0x10] sm:$0xff]  ;;  %v56_v6 = vld [vmem:[#allocation5 + $0x18] sm:$0xff]  ;;  %s356_s2 = smov [#allocation8]  }
  0x39   :  { %v222_v4 = vpack.c.bf16 %v54_v3, %v53_v2  ;;  %v225_v7 = vpack.c.bf16 %v56_v6, %v55_v5  ;;  %v57_v8 = vld [vmem:[#allocation5 + $0x20] sm:$0xff]  ;;  %v58_v9 = vld [vmem:[#allocation5 + $0x28] sm:$0xff]  ;;  %v59_v11 = vld [vmem:[#allocation5 + $0x30] sm:$0xff]  ;;  %v144_v28 = vshrl.u32 %v143_v27, 7  ;;  %s159_s22 = sshll.u32 %s356_s2, 4  ;;  %s160_s22 = int_to_ptr.vmem [resolvable:$true] %s159_s22 }
  0x3a   :  { %v228_v10 = vpack.c.bf16 %v58_v9, %v57_v8  ;;  %v60_v12 = vld [vmem:[#allocation5 + $0x38] sm:$0xff]  ;;  %v61_v14 = vld [vmem:[#allocation5 + $0x40] sm:$0xff]  ;;  %v62_v15 = vld [vmem:[#allocation5 + $0x48] sm:$0xff]  ;;  %s320_s23 = scalar_lea.vmem %s160_s22, 128  ;;  %p325_p11 = scmp.lt.s32.totalorder %s160_s22, %s160_s22 }
  0x3b   :  { %223 = vmatpush3.bf16.xpose.msra.mxu0 %v222_v4  ;;  %v231_v13 = vpack.c.bf16 %v60_v12, %v59_v11  ;;  %v234_v16 = vpack.c.bf16 %v62_v15, %v61_v14  ;;  %v63_v17 = vld [vmem:[#allocation5 + $0x50] sm:$0xff]  ;;  %v64_v18 = vld [vmem:[#allocation5 + $0x58] sm:$0xff]  ;;  %v65_v20 = vld [vmem:[#allocation5 + $0x60] sm:$0xff]  ;;  %v145_v31 = vsub.s32 0, %v144_v28  ;;  %p321_p10 = scmp.ne.s32.totalorder %s160_s22, %s320_s23  ;;  %p326_p12 = scmp.lt.s32.totalorder %s320_s23, %s320_s23 }
  0x3c   :  { %224 = vmatprep.subr.bf16.mxu0 %v353_v0  ;;  %v237_v19 = vpack.c.bf16 %v64_v18, %v63_v17  ;;  %v66_v21 = vld [vmem:[#allocation5 + $0x68] sm:$0xff]  ;;  %v67_v23 = vld [vmem:[#allocation5 + $0x70] sm:$0xff]  ;;  %v68_v24 = vld [vmem:[#allocation5 + $0x78] sm:$0xff] }
  0x3d   :  { %v240_v22 = vpack.c.bf16 %v66_v21, %v65_v20  ;;  %v243_v25 = vpack.c.bf16 %v68_v24, %v67_v23  ;;  %v52_v26 = vld [vmem:[#allocation2] sm:$0xff]  ;;  %v140_v29 = vld [vmem:[#allocation7] sm:$0x1]  ;;  %p327_p13 = por %p326_p12, %p325_p11 }
  0x3e   :  { %v141_v30 = vmul.f32 0.01, %v140_v29 }
  0x3f   :  { %p328_p0 = pnand %p327_p13, %p321_p10 }
  0x40   :  { %v146_v32 = vrot.slane %v141_v30, %v145_v31 }
  0x43   :  { %226 = vmatpush3.bf16.xpose.msra.mxu0 %v225_v7 }
  0x44   :  { %227 = vmatprep.subr.bf16.mxu0 %v353_v0 }
  0x4b   :  { %229 = vmatpush3.bf16.xpose.msra.mxu0 %v228_v10 }
  0x4c   :  { %230 = vmatprep.subr.bf16.mxu0 %v353_v0 }
  0x53   :  { %232 = vmatpush3.bf16.xpose.msra.mxu0 %v231_v13 }
  0x54   :  { %233 = vmatprep.subr.bf16.mxu0 %v353_v0 }
  0x5b   :  { %235 = vmatpush3.bf16.xpose.msra.mxu0 %v234_v16 }
  0x5c   :  { %236 = vmatprep.subr.bf16.mxu0 %v353_v0 }
  0x63   :  { %238 = vmatpush3.bf16.xpose.msra.mxu0 %v237_v19 }
  0x64   :  { %239 = vmatprep.subr.bf16.mxu0 %v353_v0 }
  0x6b   :  { %241 = vmatpush3.bf16.xpose.msra.mxu0 %v240_v22 }
  0x6c   :  { %242 = vmatprep.subr.bf16.mxu0 %v353_v0 }
  0x73   :  { %244 = vmatpush3.bf16.xpose.msra.mxu0 %v243_v25 }
  0x7a   :  { %219 = vmatmul.mubr.f32.vlgmr.msra.gmra.mrb[0].mxu0 %v52_v26 }
 0x14d   :  { %v135_v33 = vpop.f32.mrb[0].mxu0 }
 0x14e   :  { %v139_v34 = vmul.f32 0.0017677669, %v135_v33  ;;  %v220_v35 = vpop.f32.mrb[1].mxu0 }
 0x150   :  { %v148_v36 = vadd.f32 %v146_v32, %v139_v34 }
 0x152   :  { %v150_v37 = vmul.f32 0.2, %v148_v36  ;;  %vm149_vm1 = vcmp.ge.f32.partialorder %v148_v36, 0.0 }
 0x154   :  { %v151_v38 = vsel %vm149_vm1, %v148_v36, %v150_v37 }
 0x155   :  { %152 = vst [vmem:[#allocation8] sm:$0xff] %v151_v38 }
 0x156   :  { %331 = shalt.err (!%p328_p0)
}
 0x157   :  { %s332_s26 = scalar_lea.hbm %s428_s3, 128 }
 0x158   :  { %p333_p1 = scmp.ne.s32.totalorder %s428_s3, %s332_s26  ;;  %p336_p2 = scmp.lt.u32.totalorder %s332_s26, %s428_s3 }
 0x15a   :  { %p338_p3 = pnand %p336_p2, %p333_p1 }
 0x15c   :  { %341 = shalt.err (!%p338_p3)
}
 0x15d   :  { %162 = dma.vmem_to_hbm [thread:$0]  %s160_s22, 128, %s428_s3, [#allocation4]  }
 0x15e   :  { %346 = dma.done.wait [#allocation4], 128  }
 0x15f   :  { %347 = vsyncadd [#allocation4], 4294967168 }
 0x160   :  { %166 = vsyncpa [#allocation3], 1 }
 0x161   :  { %167 = vsyncpa [#allocation6], 1 }
 0x162   :  { %168 = vsyncpa [#allocation4], 1 }

</bundles_post_ra>
